<compile_context>
chip_gen: v7x
topology: tpu7x:2x2x1
jax: 0.10.0
libtpu: 0.0.40
codegen_flags: <defaults>
</compile_context>

<pallas_src>
import functools

import jax
import jax.numpy as jnp
from jax.experimental import pallas as pl
from jax.experimental.pallas import tpu as pltpu


def _textstream_kernel(x_ref, w_ref, b_ref, o_ref):
    # x_ref: [TB, D_in] bf16   w_ref: [D_in, D_out] bf16 (grid-resident)
    # b_ref: [1, D_out] f32    o_ref: [TB, D_out]
    # Linear: y = x @ W + b  — MXU bf16 matmul, f32 accumulate, f32 epilogue.
    y = jnp.dot(x_ref[...], w_ref[...], preferred_element_type=jnp.float32)
    y = y + b_ref[...]
    # F.normalize(p=2, dim=1): y / max(||y||, 1e-12)
    #   == y * rsqrt(max(||y||^2, 1e-24))   (EUP rsqrt instead of sqrt+div)
    sq_sum = jnp.sum(y * y, axis=1, keepdims=True)
    inv_norm = jax.lax.rsqrt(jnp.maximum(sq_sum, 1e-24))
    o_ref[...] = (y * inv_norm).astype(o_ref.dtype)


@functools.partial(jax.jit, static_argnames=("block_b", "out_dtype"))
def textstream_forward(cls_tokens, fc_weight, fc_bias, *, block_b=512,
                       out_dtype=jnp.float32):
    """cls_tokens: [B, D_in], fc_weight: [D_in, D_out], fc_bias: [D_out]."""
    B, D_in = cls_tokens.shape
    D_out = fc_weight.shape[1]

    # bf16 operands for the MXU / half the HBM->VMEM traffic; f32 bias for the
    # f32 epilogue.
    x = cls_tokens.astype(jnp.bfloat16)
    w = fc_weight.astype(jnp.bfloat16)
    b = fc_bias.reshape(1, D_out).astype(jnp.float32)

    # Batch tile: multiple of 16 (bf16 sublane packing), capped at block_b.
    tb = min(block_b, max(B, 1))
    tb = max(16, ((tb + 15) // 16) * 16)
    num_blocks = pl.cdiv(B, tb)
    b_pad = num_blocks * tb
    if b_pad != B:
        x = jnp.pad(x, ((0, b_pad - B), (0, 0)))

    cost = pl.CostEstimate(
        flops=2 * b_pad * D_in * D_out,
        transcendentals=b_pad,
        bytes_accessed=(x.size * 2 + w.size * 2 + b.size * 4
                        + b_pad * D_out * jnp.dtype(out_dtype).itemsize),
    )

    out = pl.pallas_call(
        _textstream_kernel,
        out_shape=jax.ShapeDtypeStruct((b_pad, D_out), out_dtype),
        grid=(num_blocks,),
        in_specs=[
            pl.BlockSpec((tb, D_in), lambda i: (i, 0)),        # x tile, pipelined
            pl.BlockSpec((D_in, D_out), lambda i: (0, 0)),     # W, VMEM-resident
            pl.BlockSpec((1, D_out), lambda i: (0, 0)),        # bias, VMEM-resident
        ],
        out_specs=pl.BlockSpec((tb, D_out), lambda i: (i, 0)),
        compiler_params=pltpu.CompilerParams(
            dimension_semantics=("parallel",)),
        cost_estimate=cost,
    )(x, w, b)
    return out[:B]


if __name__ == "__main__":
    # Small shapes consistent with the module: batch=2 sentences; 128 is the
    # lane-aligned stand-in for bert_hidden=768 and hidden_dim=1024.
    B, BERT_HIDDEN, HIDDEN_DIM = 2, 128, 128

    key = jax.random.PRNGKey(0)
    k_cls, k_w, k_b = jax.random.split(key, 3)

    # Deterministic synthetic CLS-token embeddings (BERT output stand-in).
    cls_tokens = jax.random.normal(k_cls, (B, BERT_HIDDEN), dtype=jnp.float32)

    # Deterministic fc parameters (nn.Linear(bert_hidden, hidden_dim)).
    fc_weight = jax.random.normal(k_w, (BERT_HIDDEN, HIDDEN_DIM),
                                  dtype=jnp.float32) * 0.02
    fc_bias = jax.random.normal(k_b, (HIDDEN_DIM,), dtype=jnp.float32) * 0.02

    out = textstream_forward(cls_tokens, fc_weight, fc_bias)
    out = jax.block_until_ready(out)

    # Reference (plain JAX, f32): linear + L2 normalize along dim=1.
    y_ref = cls_tokens @ fc_weight + fc_bias
    nrm = jnp.maximum(jnp.linalg.norm(y_ref, axis=1, keepdims=True), 1e-12)
    ref = y_ref / nrm

    assert out.shape == (B, HIDDEN_DIM)
    # bf16 MXU operands vs f32 reference -> looser tolerance (precision
    # tradeoff, not a bug).
    assert jnp.allclose(out, ref, atol=2e-2, rtol=2e-2), (
        float(jnp.max(jnp.abs(out - ref))))
    # Outputs are unit-norm rows.
    assert jnp.allclose(jnp.linalg.norm(out, axis=1), 1.0, atol=1e-3)

    print("KERNEL_OK")
</pallas_src>

<mosaic_0001>
module attributes {stable_mosaic.version = 11 : i64} {
  func.func @_textstream_kernel(%arg0: i32, %arg1: memref<16x128xbf16, #tpu.memory_space<vmem>>, %arg2: memref<128x128xbf16, #tpu.memory_space<vmem>>, %arg3: memref<1x128xf32, #tpu.memory_space<vmem>>, %arg4: memref<16x128xf32, #tpu.memory_space<vmem>>) attributes {dimension_semantics = [#tpu.dimension_semantics<parallel>], iteration_bounds = array<i64: 1>, scalar_prefetch = 0 : i64, scratch_operands = 0 : i64, tpu.core_type = #tpu.core_type<tc>, window_params = [{transform_indices = @transform_0, window_bounds = array<i64: 16, 128>}, {pipeline_mode = #tpu.pipeline_mode<synchronous>, transform_indices = @transform_1, window_bounds = array<i64: 128, 128>}, {pipeline_mode = #tpu.pipeline_mode<synchronous>, transform_indices = @transform_2, window_bounds = array<i64: 1, 128>}, {transform_indices = @transform_3, window_bounds = array<i64: 16, 128>}]} {
    %c0 = arith.constant 0 : index
    %c0_0 = arith.constant 0 : index
    %0 = vector.load %arg1[%c0, %c0_0] : memref<16x128xbf16, #tpu.memory_space<vmem>>, vector<16x128xbf16>
    %c0_1 = arith.constant 0 : index
    %c0_2 = arith.constant 0 : index
    %1 = vector.load %arg2[%c0_1, %c0_2] : memref<128x128xbf16, #tpu.memory_space<vmem>>, vector<128x128xbf16>
    %cst = arith.constant dense<0.000000e+00> : vector<16x128xf32>
    %2 = tpu.matmul %0, %1, %cst {dimension_numbers = #tpu.dot_dimension_numbers<[1], [0], [0], [1], [0, 0, 1, 1], [], []>} : vector<16x128xbf16>, vector<128x128xbf16>, vector<16x128xf32> -> vector<16x128xf32>
    %c0_3 = arith.constant 0 : index
    %c0_4 = arith.constant 0 : index
    %3 = vector.load %arg3[%c0_3, %c0_4] : memref<1x128xf32, #tpu.memory_space<vmem>>, vector<1x128xf32>
    %4 = vector.broadcast %3 : vector<1x128xf32> to vector<16x128xf32>
    %5 = arith.addf %2, %4 : vector<16x128xf32>
    %6 = arith.mulf %5, %5 : vector<16x128xf32>
    %cst_5 = arith.constant dense<0.000000e+00> : vector<16xf32>
    %7 = vector.multi_reduction <add>, %6, %cst_5 [1] : vector<16x128xf32> to vector<16xf32>
    %8 = vector.shape_cast %7 : vector<16xf32> to vector<16x1xf32>
    %cst_6 = arith.constant 1.000000e-24 : f32
    %9 = vector.broadcast %cst_6 : f32 to vector<16x1xf32>
    %10 = arith.maximumf %8, %9 : vector<16x1xf32>
    %11 = math.rsqrt %10 : vector<16x1xf32>
    %12 = vector.broadcast %11 : vector<16x1xf32> to vector<16x128xf32>
    %13 = arith.mulf %5, %12 : vector<16x128xf32>
    %c0_7 = arith.constant 0 : index
    %c0_8 = arith.constant 0 : index
    %14 = vector.load %arg4[%c0_7, %c0_8] : memref<16x128xf32, #tpu.memory_space<vmem>>, vector<16x128xf32>
    tpu.vector_store %arg4[%c0_7, %c0_8], %13 {strides = array<i32>} : memref<16x128xf32, #tpu.memory_space<vmem>>, vector<16x128xf32>,
    return
  }
  func.func @transform_0(%arg0: i32) -> (i32, i32) {
    %c0_i32 = arith.constant 0 : i32
    %c0_i32_0 = arith.constant 0 : i32
    return %arg0, %c0_i32 : i32, i32
  }
  func.func @transform_1(%arg0: i32) -> (i32, i32) {
    %c0_i32 = arith.constant 0 : i32
    %c0_i32_0 = arith.constant 0 : i32
    %c0_i32_1 = arith.constant 0 : i32
    return %c0_i32, %c0_i32_0 : i32, i32
  }
  func.func @transform_2(%arg0: i32) -> (i32, i32) {
    %c0_i32 = arith.constant 0 : i32
    %c0_i32_0 = arith.constant 0 : i32
    %c0_i32_1 = arith.constant 0 : i32
    return %c0_i32, %c0_i32_0 : i32, i32
  }
  func.func @transform_3(%arg0: i32) -> (i32, i32) {
    %c0_i32 = arith.constant 0 : i32
    %c0_i32_0 = arith.constant 0 : i32
    return %arg0, %c0_i32 : i32, i32
  }
}

</mosaic_0001>

<bundles_post_ra>
// kernel: textstream_forward.1
= control target key start
LH: loop header
LB: loop body
LE: loop exit
PB: predicated region body
PF: predicated region fallthrough
CT: control target
= control target key end

     0   :  { %v207_v0 = vmov 0.0   ;;  %vm208_vm0 = vmmov 0   ;;  %s265_s1 = inlined_call_operand.vmem [shape: bf16[128,128], index: 1, kind: input, shape index: {}]   ;;  %s266_s0 = inlined_call_operand.vmem [shape: bf16[16,128], index: 0, kind: input, shape index: {}]   ;;  %s267_s2 = inlined_call_operand.vmem [shape: f32[1,128], index: 2, kind: input, shape index: {}]   ;;  %s268_s3 = inlined_call_operand.vmem [shape: f32[16,128], index: 3, kind: output, shape index: {}]  }
   0x1   :  { %172 = vmatprep.subr.bf16.mxu0 %v207_v0  ;;  %v194_v1 = vld [vmem:[%s265_s1] sm:$0xff]   ;;  %188 = vmatprep.mubr.msk.bf16.mxu0 %vm208_vm0, %v207_v0  ;;  %v195_v2 = vld [vmem:[%s265_s1 + $0x8] sm:$0xff]   ;;  %v196_v3 = vld [vmem:[%s265_s1 + $0x10] sm:$0xff]  }
   0x2   :  { %173 = vmatpush3.bf16.msra.mxu0 %v194_v1  ;;  %v197_v4 = vld [vmem:[%s265_s1 + $0x18] sm:$0xff]   ;;  %v198_v5 = vld [vmem:[%s265_s1 + $0x20] sm:$0xff]   ;;  %v199_v6 = vld [vmem:[%s265_s1 + $0x28] sm:$0xff]  }
   0x3   :  { %174 = vmatprep.subr.bf16.mxu0 %v207_v0  ;;  %v200_v7 = vld [vmem:[%s265_s1 + $0x30] sm:$0xff]   ;;  %v201_v8 = vld [vmem:[%s265_s1 + $0x38] sm:$0xff]   ;;  %v202_v9 = vld [vmem:[%s266_s0] sm:$0xff]  }
   0x4   :  { %v153_v10 = vld [vmem:[%s267_s2] ss:$0 sm:$0xff] }
   0x6   :  { %175 = vmatpush3.bf16.msra.mxu0 %v195_v2 }
   0x7   :  { %176 = vmatprep.subr.bf16.mxu0 %v207_v0 }
   0xa   :  { %177 = vmatpush3.bf16.msra.mxu0 %v196_v3 }
   0xb   :  { %178 = vmatprep.subr.bf16.mxu0 %v207_v0 }
   0xe   :  { %179 = vmatpush3.bf16.msra.mxu0 %v197_v4 }
   0xf   :  { %180 = vmatprep.subr.bf16.mxu0 %v207_v0 }
  0x12   :  { %181 = vmatpush3.bf16.msra.mxu0 %v198_v5 }
  0x13   :  { %182 = vmatprep.subr.bf16.mxu0 %v207_v0 }
  0x16   :  { %183 = vmatpush3.bf16.msra.mxu0 %v199_v6 }
  0x17   :  { %184 = vmatprep.subr.bf16.mxu0 %v207_v0 }
  0x1a   :  { %185 = vmatpush3.bf16.msra.mxu0 %v200_v7 }
  0x1b   :  { %186 = vmatprep.subr.bf16.mxu0 %v207_v0 }
  0x1e   :  { %187 = vmatpush3.bf16.msra.mxu0 %v201_v8 }
  0x21   :  { %189 = vmatmul.mubr.bf16.vlgmr.msra.gmra.mrb[0].mxu0 %v202_v9 }
  0xf4   :  { %v128_v11 = vpop.f32.mrb[0].mxu0 }
  0xf5   :  { %v129_v12 = vadd.f32 %v153_v10, %v128_v11  ;;  %v190_v13 = vpop.f32.mrb[1].mxu0 }
  0xf6   :  { %v131_v14 = vpop.f32.mrb[2].mxu0 }
  0xf7   :  { %v132_v15 = vadd.f32 %v153_v10, %v131_v14  ;;  %v191_v16 = vpop.f32.mrb[3].mxu0  ;;  %v135_v17 = vmul.f32 %v129_v12, %v129_v12 }
  0xf9   :  { %137 = vadd.xlane.f32.xlu0 %v135_v17  ;;  %v136_v18 = vmul.f32 %v132_v15, %v132_v15 }
  0xfd   :  { %139 = vadd.xlane.f32.xlu0 %v136_v18 }
 0x186   :  { %v138_v19 = vpop.xlane.xlu0 %137 }
 0x187   :  { %v141_v20 = vmax.f32 %v138_v19, 1e-24 }
 0x189   :  { %203 = vrsqrt.f32 %v141_v20 }
 0x18a   :  { %v140_v21 = vpop.xlane.xlu0 %139 }
 0x18b   :  { %v142_v22 = vmax.f32 %v140_v21, 1e-24 }
 0x18d   :  { %205 = vrsqrt.f32 %v142_v22 }
 0x193   :  { %v204_v23 = vpop.eup %203 }
 0x194   :  { %v145_v24 = vmul.f32 %v204_v23, %v129_v12 }
 0x196   :  { %147 = vst [vmem:[%s268_s3] sm:$0xff] %v145_v24 }
 0x197   :  { %v206_v25 = vpop.eup %205 }
 0x198   :  { %v146_v26 = vmul.f32 %v206_v25, %v132_v15 }
 0x19a   :  { %148 = vst [vmem:[%s268_s3 + $0x8] sm:$0xff] %v146_v26 }

</bundles_post_ra>
